<compile_context>
chip_gen: v7x
topology: tpu7x:2x2x1
jax: 0.10.0
libtpu: 0.0.40
codegen_flags: <defaults>
</compile_context>

<pallas_src>
import functools

import jax
import jax.numpy as jnp
from jax.experimental import pallas as pl
from jax.experimental.pallas import tpu as pltpu

LN_EPS = 1e-5


def _round_up(x, m):
    return ((x + m - 1) // m) * m


def _to_logits_kernel(x_ref, w_ref, b_ref, o_ref):
    # x tile: (tile_m, dim); w tile: (dim, tile_n); b tile: (1, tile_n)
    x = x_ref[...].astype(jnp.float32)

    # Single LayerNorm statistics pass (affine folded into w/b).
    mu = jnp.mean(x, axis=-1, keepdims=True)
    var = jnp.mean((x - mu) * (x - mu), axis=-1, keepdims=True)
    xn = (x - mu) * jax.lax.rsqrt(var + LN_EPS)

    # Feed the MXU in the weight dtype (bf16 if weights were shipped as bf16),
    # accumulate in fp32.
    xn = xn.astype(w_ref.dtype)
    out = jnp.dot(xn, w_ref[...], preferred_element_type=jnp.float32)
    out = out + b_ref[...].astype(jnp.float32)

    # Single lane-dense store of the full (coord ++ token) tile.
    o_ref[...] = out.astype(o_ref.dtype)


@functools.partial(jax.jit, static_argnames=("tile_m", "tile_n", "weight_dtype"))
def to_logits_net(x, params, *, tile_m=256, tile_n=1024, weight_dtype=None):
    """x: (..., dim) -> (..., coord_dims + dict_size). Matches ToLogitsNet.forward."""
    dim = x.shape[-1]
    lead_shape = x.shape[:-1]
    x2d = x.reshape(-1, dim)
    M = x2d.shape[0]

    # ---- fold LN affine + both heads into one weight / bias (done in fp32) ----
    gt = params["ln_tok_g"].reshape(dim).astype(jnp.float32)
    bt = params["ln_tok_b"].reshape(dim).astype(jnp.float32)
    wt = params["w_tok"].astype(jnp.float32)          # (dim, dict_size)
    gc = params["ln_crd_g"].reshape(dim).astype(jnp.float32)
    bc = params["ln_crd_b"].reshape(dim).astype(jnp.float32)
    wc = params["w_crd"].astype(jnp.float32)          # (dim, coord_dims)

    coord_dims = wc.shape[1]
    dict_size = wt.shape[1]
    out_dim = coord_dims + dict_size

    w_fold = jnp.concatenate([wc * gc[:, None], wt * gt[:, None]], axis=1)  # (dim, out_dim)
    b_fold = jnp.concatenate([bc @ wc, bt @ wt], axis=0)[None, :]           # (1, out_dim)

    if weight_dtype is not None:
        w_fold = w_fold.astype(weight_dtype)

    # ---- tile sizing: clamp to problem, keep (8, 128) alignment ----
    tm = _round_up(max(8, min(tile_m, _round_up(M, 8))), 8)
    tn = _round_up(max(128, min(tile_n, _round_up(out_dim, 128))), 128)

    Mp = _round_up(M, tm)
    Np = _round_up(out_dim, tn)

    if Mp != M:
        x2d = jnp.pad(x2d, ((0, Mp - M), (0, 0)))
    if Np != out_dim:
        w_fold = jnp.pad(w_fold, ((0, 0), (0, Np - out_dim)))
        b_fold = jnp.pad(b_fold, ((0, 0), (0, Np - out_dim)))

    # N axis OUTER so each weight tile is read from HBM once and reused over M.
    grid = (Np // tn, Mp // tm)

    out = pl.pallas_call(
        _to_logits_kernel,
        out_shape=jax.ShapeDtypeStruct((Mp, Np), x.dtype),
        grid_spec=pltpu.PrefetchScalarGridSpec(
            num_scalar_prefetch=0,
            grid=grid,
            in_specs=[
                pl.BlockSpec((tm, dim), lambda n, m: (m, 0)),   # x tile
                pl.BlockSpec((dim, tn), lambda n, m: (0, n)),   # folded weight tile
                pl.BlockSpec((1, tn), lambda n, m: (0, n)),     # folded bias tile
            ],
            out_specs=pl.BlockSpec((tm, tn), lambda n, m: (m, n)),
        ),
        compiler_params=pltpu.CompilerParams(
            dimension_semantics=("parallel", "parallel"),
            vmem_limit_bytes=32 * 1024 * 1024,
        ),
    )(x2d, w_fold, b_fold)

    out = out[:M, :out_dim]
    return out.reshape(*lead_shape, out_dim)


def init_params(key, dim, coord_dims, dict_size, dtype=jnp.float32):
    # Non-trivial gamma/beta so the LN-affine folding path is actually exercised.
    k1, k2, k3, k4, k5, k6 = jax.random.split(key, 6)
    return {
        "ln_tok_g": (1.0 + 0.1 * jax.random.normal(k3, (1, dim))).astype(dtype),
        "ln_tok_b": (0.1 * jax.random.normal(k4, (1, dim))).astype(dtype),
        "w_tok": (jax.random.normal(k1, (dim, dict_size)) * 0.02).astype(dtype),
        "ln_crd_g": (1.0 + 0.1 * jax.random.normal(k5, (1, dim))).astype(dtype),
        "ln_crd_b": (0.1 * jax.random.normal(k6, (1, dim))).astype(dtype),
        "w_crd": (jax.random.normal(k2, (dim, coord_dims)) * 0.02).astype(dtype),
    }


def _reference(x, params):
    def ln(v, g, b):
        v = v.astype(jnp.float32)
        mu = jnp.mean(v, axis=-1, keepdims=True)
        var = jnp.mean((v - mu) ** 2, axis=-1, keepdims=True)
        return (v - mu) * jax.lax.rsqrt(var + LN_EPS) * g[0] + b[0]

    tok = ln(x, params["ln_tok_g"], params["ln_tok_b"]) @ params["w_tok"]
    crd = ln(x, params["ln_crd_g"], params["ln_crd_b"]) @ params["w_crd"]
    return jnp.concatenate((crd, tok), axis=-1).astype(x.dtype)


if __name__ == "__main__":
    batch, seq = 2, 8
    dim, coord_dims, dict_size = 32, 2, 16

    key = jax.random.PRNGKey(0)
    kx, kp = jax.random.split(key)
    x = jax.random.normal(kx, (batch, seq, dim), jnp.float32)
    params = init_params(kp, dim, coord_dims, dict_size)

    out = to_logits_net(x, params)
    out = jax.block_until_ready(out)

    ref = _reference(x, params)
    assert out.shape == (batch, seq, coord_dims + dict_size)
    assert jnp.allclose(out, ref, atol=1e-4, rtol=1e-4), (
        float(jnp.max(jnp.abs(out - ref))))

    print("KERNEL_OK")
</pallas_src>

<mosaic_0001>
module attributes {stable_mosaic.version = 11 : i64} {
  func.func @_to_logits_kernel(%arg0: i32, %arg1: i32, %arg2: memref<16x32xf32, #tpu.memory_space<vmem>>, %arg3: memref<32x128xf32, #tpu.memory_space<vmem>>, %arg4: memref<1x128xf32, #tpu.memory_space<vmem>>, %arg5: memref<16x128xf32, #tpu.memory_space<vmem>>) attributes {dimension_semantics = [#tpu.dimension_semantics<parallel>, #tpu.dimension_semantics<parallel>], iteration_bounds = array<i64: 1, 1>, scalar_prefetch = 0 : i64, scratch_operands = 0 : i64, tpu.core_type = #tpu.core_type<tc>, window_params = [{transform_indices = @transform_0, window_bounds = array<i64: 16, 32>}, {transform_indices = @transform_1, window_bounds = array<i64: 32, 128>}, {transform_indices = @transform_2, window_bounds = array<i64: 1, 128>}, {transform_indices = @transform_3, window_bounds = array<i64: 16, 128>}]} {
    %c0 = arith.constant 0 : index
    %c0_0 = arith.constant 0 : index
    %0 = vector.load %arg2[%c0, %c0_0] : memref<16x32xf32, #tpu.memory_space<vmem>>, vector<16x32xf32>
    %cst = arith.constant dense<0.000000e+00> : vector<16xf32>
    %1 = vector.multi_reduction <add>, %0, %cst [1] : vector<16x32xf32> to vector<16xf32>
    %2 = vector.shape_cast %1 : vector<16xf32> to vector<16x1xf32>
    %cst_1 = arith.constant 3.200000e+01 : f32
    %3 = vector.broadcast %cst_1 : f32 to vector<16x1xf32>
    %4 = arith.divf %2, %3 : vector<16x1xf32>
    %5 = vector.broadcast %4 : vector<16x1xf32> to vector<16x32xf32>
    %6 = arith.subf %0, %5 : vector<16x32xf32>
    %7 = vector.broadcast %4 : vector<16x1xf32> to vector<16x32xf32>
    %8 = arith.subf %0, %7 : vector<16x32xf32>
    %9 = arith.mulf %6, %8 : vector<16x32xf32>
    %cst_2 = arith.constant dense<0.000000e+00> : vector<16xf32>
    %10 = vector.multi_reduction <add>, %9, %cst_2 [1] : vector<16x32xf32> to vector<16xf32>
    %11 = vector.shape_cast %10 : vector<16xf32> to vector<16x1xf32>
    %cst_3 = arith.constant 3.200000e+01 : f32
    %12 = vector.broadcast %cst_3 : f32 to vector<16x1xf32>
    %13 = arith.divf %11, %12 : vector<16x1xf32>
    %14 = vector.broadcast %4 : vector<16x1xf32> to vector<16x32xf32>
    %15 = arith.subf %0, %14 : vector<16x32xf32>
    %cst_4 = arith.constant 9.99999974E-6 : f32
    %16 = vector.broadcast %cst_4 : f32 to vector<16x1xf32>
    %17 = arith.addf %13, %16 : vector<16x1xf32>
    %18 = math.rsqrt %17 : vector<16x1xf32>
    %19 = vector.broadcast %18 : vector<16x1xf32> to vector<16x32xf32>
    %20 = arith.mulf %15, %19 : vector<16x32xf32>
    %c0_5 = arith.constant 0 : index
    %c0_6 = arith.constant 0 : index
    %21 = vector.load %arg3[%c0_5, %c0_6] : memref<32x128xf32, #tpu.memory_space<vmem>>, vector<32x128xf32>
    %cst_7 = arith.constant dense<0.000000e+00> : vector<16x128xf32>
    %22 = tpu.matmul %20, %21, %cst_7 {dimension_numbers = #tpu.dot_dimension_numbers<[1], [0], [0], [1], [0, 0, 1, 1], [], []>} : vector<16x32xf32>, vector<32x128xf32>, vector<16x128xf32> -> vector<16x128xf32>
    %c0_8 = arith.constant 0 : index
    %c0_9 = arith.constant 0 : index
    %23 = vector.load %arg4[%c0_8, %c0_9] : memref<1x128xf32, #tpu.memory_space<vmem>>, vector<1x128xf32>
    %24 = vector.broadcast %23 : vector<1x128xf32> to vector<16x128xf32>
    %25 = arith.addf %22, %24 : vector<16x128xf32>
    %c0_10 = arith.constant 0 : index
    %c0_11 = arith.constant 0 : index
    %26 = vector.load %arg5[%c0_10, %c0_11] : memref<16x128xf32, #tpu.memory_space<vmem>>, vector<16x128xf32>
    tpu.vector_store %arg5[%c0_10, %c0_11], %25 {strides = array<i32>} : memref<16x128xf32, #tpu.memory_space<vmem>>, vector<16x128xf32>,
    return
  }
  func.func @transform_0(%arg0: i32, %arg1: i32) -> (i32, i32) {
    %c0_i32 = arith.constant 0 : i32
    %c0_i32_0 = arith.constant 0 : i32
    return %arg1, %c0_i32 : i32, i32
  }
  func.func @transform_1(%arg0: i32, %arg1: i32) -> (i32, i32) {
    %c0_i32 = arith.constant 0 : i32
    %c0_i32_0 = arith.constant 0 : i32
    return %c0_i32, %arg0 : i32, i32
  }
  func.func @transform_2(%arg0: i32, %arg1: i32) -> (i32, i32) {
    %c0_i32 = arith.constant 0 : i32
    %c0_i32_0 = arith.constant 0 : i32
    return %c0_i32, %arg0 : i32, i32
  }
  func.func @transform_3(%arg0: i32, %arg1: i32) -> (i32, i32) {
    %c0_i32 = arith.constant 0 : i32
    return %arg1, %arg0 : i32, i32
  }
}

</mosaic_0001>

<bundles_post_ra>
// kernel: to_logits_net.1
= control target key start
LH: loop header
LB: loop body
LE: loop exit
PB: predicated region body
PF: predicated region fallthrough
CT: control target
= control target key end

     0   :  { %vm16_vm0 = vcmask 261120   ;;  %s227_s0 = inlined_call_operand.vmem [shape: f32[16,32], index: 0, kind: input, shape index: {}]   ;;  %s228_s1 = inlined_call_operand.vmem [shape: f32[32,128], index: 1, kind: input, shape index: {}]   ;;  %s229_s2 = inlined_call_operand.vmem [shape: f32[1,128], index: 2, kind: input, shape index: {}]   ;;  %s230_s3 = inlined_call_operand.vmem [shape: f32[16,128], index: 3, kind: output, shape index: {}]  }
   0x1   :  { %v14_v0 = vld [vmem:[%s227_s0] sm:$0xff]  ;;  %v15_v1 = vld [vmem:[%s227_s0 + $0x8] sm:$0xff]  ;;  %v46_v16 = vld [vmem:[%s228_s1 + $0x10] sm:$0xff] }
   0x2   :  { %v17_v2 = vsel %vm16_vm0, %v14_v0, 0.0  ;;  %v20_v3 = vsel %vm16_vm0, %v15_v1, 0.0  ;;  %v44_v14 = vld [vmem:[%s228_s1] sm:$0xff]  ;;  %v45_v15 = vld [vmem:[%s228_s1 + $0x8] sm:$0xff]  ;;  %v47_v18 = vld [vmem:[%s228_s1 + $0x18] sm:$0xff] }
   0x3   :  { %18 = vadd.xlane.f32.xlu0 %v17_v2  ;;  %v162_v17 = vpack.c.bf16 %v45_v15, %v44_v14  ;;  %v166_v19 = vpack.c.bf16 %v47_v18, %v46_v16  ;;  %v142_v30 = vld [vmem:[%s229_s2] ss:$0 sm:$0xff] }
   0x5   :  { %163 = vmatprep.subr.bf16.mxu0 %v162_v17 }
   0x6   :  { %165 = vmatpush3.bf16.msra.mxu0 %v162_v17 }
   0x7   :  { %21 = vadd.xlane.f32.xlu0 %v20_v3  ;;  %167 = vmatprep.subr.bf16.mxu0 %v166_v19 }
   0xa   :  { %169 = vmatpush3.bf16.msra.mxu0 %v166_v19 }
  0x90   :  { %v19_v4 = vpop.xlane.xlu0 %18 }
  0x91   :  { %v24_v5 = vmul.f32 0.03125, %v19_v4 }
  0x93   :  { %v26_v6 = vsub.f32 %v14_v0, %v24_v5 }
  0x94   :  { %v22_v7 = vpop.xlane.xlu0 %21 }
  0x95   :  { %v25_v8 = vmul.f32 0.03125, %v22_v7  ;;  %v28_v9 = vmul.f32 %v26_v6, %v26_v6 }
  0x97   :  { %v27_v10 = vsub.f32 %v15_v1, %v25_v8  ;;  %v30_v11 = vsel %vm16_vm0, %v28_v9, 0.0 }
  0x98   :  { %31 = vadd.xlane.f32.xlu1 %v30_v11 }
  0x99   :  { %v29_v12 = vmul.f32 %v27_v10, %v27_v10 }
  0x9b   :  { %v33_v13 = vsel %vm16_vm0, %v29_v12, 0.0 }
  0x9c   :  { %34 = vadd.xlane.f32.xlu1 %v33_v13 }
 0x125   :  { %v32_v20 = vpop.xlane.xlu1 %31 }
 0x126   :  { %v36_v21 = vmul.f32 0.03125, %v32_v20 }
 0x128   :  { %v38_v22 = vadd.f32 1e-05, %v36_v21 }
 0x129   :  { %v35_v23 = vpop.xlane.xlu1 %34 }
 0x12a   :  { %170 = vrsqrt.f32 %v38_v22  ;;  %v37_v24 = vmul.f32 0.03125, %v35_v23 }
 0x12c   :  { %v39_v25 = vadd.f32 1e-05, %v37_v24 }
 0x12e   :  { %172 = vrsqrt.f32 %v39_v25 }
 0x134   :  { %v171_v26 = vpop.eup %170 }
 0x135   :  { %v42_v27 = vmul.f32 %v171_v26, %v26_v6 }
 0x137   :  { %159 = vmatprep.mubr.msk.f32.mxu0 %vm16_vm0, %v42_v27 }
 0x138   :  { %v173_v28 = vpop.eup %172 }
 0x139   :  { %v43_v29 = vmul.f32 %v173_v28, %v27_v10 }
 0x13b   :  { %160 = vmatmul.mubr.msk.f32.vlgmr.msra.gmra.mrb[0].mxu0 %vm16_vm0, %v43_v29 }
 0x20e   :  { %v161_v31 = vpop.f32.mrb[0].mxu0 }
 0x20f   :  { %v133_v32 = vadd.f32 %v161_v31, %v142_v30  ;;  %v127_v33 = vpop.f32.mrb[1].mxu0 }
 0x210   :  { %v128_v34 = vadd.f32 %v142_v30, %v127_v33 }
 0x211   :  { %137 = vst [vmem:[%s230_s3 + $0x8] sm:$0xff] %v133_v32 }
 0x212   :  { %136 = vst [vmem:[%s230_s3] sm:$0xff] %v128_v34 }

</bundles_post_ra>
